<compile_context>
chip_gen: v7x
topology: tpu7x:2x2x1
jax: 0.10.0
libtpu: 0.0.40
codegen_flags: <defaults>
</compile_context>

<pallas_src>
import jax
import jax.numpy as jnp
from jax import lax
from jax.experimental import pallas as pl
from jax.experimental.pallas import tpu as pltpu


def _pxcorr_ca_kernel(k_ref, s_ref, smean_ref, w1t_ref, b1_ref, w2t_ref,
                      b2_ref, out_ref):
    # k_ref    : (Bt, C, K)   template features (flattened spatial)
    # s_ref    : (Bt, C, St)  search-feature lane tile
    # smean_ref: (Bt, C, 1)   f32 spatial mean of the FULL search map
    # w1t/w2t  : (K, K)       CA 1x1-conv weights, (in, out) orientation, f32
    # b1/b2    : (1, K)       f32
    # out_ref  : (Bt, K, St)
    k = k_ref[...]
    k_f32 = k.astype(jnp.float32)

    # ---- channel attention (tiny; constant across the S axis, so its inputs
    # are fetched once per batch block and the redundant recompute per lane
    # tile is hidden under the HBM-bound pipeline) ----
    # pooled[b,k] = mean_s sum_c kernel[b,c,k]*search[b,c,s]
    #             = sum_c kernel[b,c,k] * mean_s search[b,c,s]
    pooled = jnp.sum(k_f32 * smean_ref[...], axis=1)                      # (Bt, K)
    hidden = jnp.maximum(
        jnp.dot(pooled, w1t_ref[...], preferred_element_type=jnp.float32)
        + b1_ref[...], 0.0)
    att = jax.nn.sigmoid(
        jnp.dot(hidden, w2t_ref[...], preferred_element_type=jnp.float32)
        + b2_ref[...])                                                    # (Bt, K)

    # ---- fused xcorr + channel rescale, stored directly in the output dtype ----
    # corr[b,k,s] = att[b,k] * sum_c kernel[b,c,k] * search[b,c,s]
    #             = sum_c (kernel[b,c,k] * att[b,k]) * search[b,c,s]
    k_scaled = (k_f32 * att[:, None, :]).astype(s_ref.dtype)
    out_ref[...] = lax.dot_general(
        k_scaled, s_ref[...],
        dimension_numbers=(((1,), (1,)), ((0,), (0,))),   # contract C, batch Bt
        preferred_element_type=out_ref.dtype)             # single-pass f32 MXU acc


@jax.jit
def pixelwise_xcorr(kernel_feat, search_feat, w1, b1, w2, b2):
    """kernel_feat: (B,C,Hk,Wk), search_feat: (B,C,H,W) -> (B, Hk*Wk, H, W).

    Output dtype follows the search-feature dtype (f32 or bf16); attention math
    and matmul accumulation stay in f32.
    """
    B, C, Hk, Wk = kernel_feat.shape
    _, _, H, W = search_feat.shape
    K = Hk * Wk                      # CAModule channels (64 for an 8x8 template)
    S = H * W
    dtype = search_feat.dtype
    isz = jnp.dtype(dtype).itemsize

    k_mat = kernel_feat.reshape(B, C, K).astype(dtype)
    s_mat = search_feat.reshape(B, C, S)

    # The only cross-tile dependency: spatial mean of the full search map.
    # Tiny XLA reduce (one extra read of search, smaller than the K-x larger
    # output write) so the kernel grid can tile S.
    s_mean = jnp.mean(s_mat, axis=2, keepdims=True, dtype=jnp.float32)   # (B,C,1)

    # 1x1 convs == dense layers; transpose once here (single XLA op, not per
    # grid step) so the kernel does fused (Bt,K)@(K,K) matmuls with no XLU work.
    w1t = w1.reshape(K, K).T.astype(jnp.float32)
    w2t = w2.reshape(K, K).T.astype(jnp.float32)
    b1r = b1.reshape(1, K).astype(jnp.float32)
    b2r = b2.reshape(1, K).astype(jnp.float32)

    # ---- generation-aware block sizing ----
    try:
        vmem_cap = int(getattr(pltpu.get_tpu_info(), "vmem_capacity_bytes",
                               64 << 20))
    except Exception:
        vmem_cap = 64 << 20                      # conservative (v7x-class) default
    if vmem_cap <= (64 << 20):                   # v7x: 64 MiB VMEM per TC, 2 TCs
        budget, vmem_limit = 20 << 20, 32 << 20
    else:                                        # v5e / v6e: 128 MiB VMEM, 1 TC
        budget, vmem_limit = 48 << 20, 96 << 20

    Sp128 = pl.cdiv(S, 128) * 128
    sp_tile = min(Sp128, 2048)                   # big, lane-dense DMAs

    def per_step_bytes(bt, st):
        # double-buffered I/O blocks
        io = 2 * bt * (C * K * isz + C * st * isz + C * 4 + K * st * isz)
        # (constant) CA weights/biases, conservatively double-buffered
        consts = 2 * (2 * K * K * 4 + 2 * K * 4)
        # in-kernel temporaries: k f32 upcast, k_scaled, matmul result staging
        tmp = bt * (C * K * 4 + C * K * isz + K * st * 4)
        return io + consts + tmp

    # shrink the lane tile until a single-batch block fits (25% headroom) ...
    while sp_tile > 128 and per_step_bytes(1, sp_tile) * 5 // 4 > budget:
        sp_tile = max(128, ((sp_tile // 2 + 127) // 128) * 128)
    # ... then grow batches-per-step under the same headroomed budget
    unit = per_step_bytes(1, sp_tile) * 5 // 4
    bt = max(1, min(B, budget // max(unit, 1)))

    grid_b = pl.cdiv(B, bt)                      # ragged last block is fine
    grid_s = pl.cdiv(S, sp_tile)
    # A single-step grid cannot pipeline or use both v7x TensorCores; split S.
    if grid_b * grid_s == 1 and Sp128 >= 256:
        sp_tile = ((Sp128 // 2 + 127) // 128) * 128
        grid_s = pl.cdiv(S, sp_tile)
    grid = (grid_b, grid_s)

    out = pl.pallas_call(
        _pxcorr_ca_kernel,
        out_shape=jax.ShapeDtypeStruct((B, K, S), dtype),
        grid_spec=pltpu.PrefetchScalarGridSpec(
            num_scalar_prefetch=0,
            grid=grid,
            in_specs=[
                pl.BlockSpec((bt, C, K), lambda b, s: (b, 0, 0)),
                pl.BlockSpec((bt, C, sp_tile), lambda b, s: (b, 0, s)),
                pl.BlockSpec((bt, C, 1), lambda b, s: (b, 0, 0)),
                pl.BlockSpec((K, K), lambda b, s: (0, 0)),
                pl.BlockSpec((1, K), lambda b, s: (0, 0)),
                pl.BlockSpec((K, K), lambda b, s: (0, 0)),
                pl.BlockSpec((1, K), lambda b, s: (0, 0)),
            ],
            out_specs=pl.BlockSpec((bt, K, sp_tile), lambda b, s: (b, 0, s)),
        ),
        compiler_params=pltpu.CompilerParams(
            dimension_semantics=("parallel", "parallel"),
            vmem_limit_bytes=vmem_limit),
    )(k_mat, s_mat, s_mean, w1t, b1r, w2t, b2r)

    return out.reshape(B, K, H, W)


def _reference(kernel_feat, search_feat, w1, b1, w2, b2):
    """Plain-JAX reference mirroring the PyTorch forward (for verification)."""
    B, C, Hk, Wk = kernel_feat.shape
    _, _, H, W = search_feat.shape
    K = Hk * Wk
    k_mat = kernel_feat.reshape(B, C, K).transpose(0, 2, 1)     # (B, K, C)
    s_mat = search_feat.reshape(B, C, H * W)                    # (B, C, S)
    feat = jnp.einsum("bkc,bcs->bks", k_mat, s_mat)             # (B, K, S)
    pooled = feat.mean(axis=2)                                  # (B, K)
    h = jnp.maximum(pooled @ w1.reshape(K, K).T + b1, 0.0)
    att = jax.nn.sigmoid(h @ w2.reshape(K, K).T + b2)           # (B, K)
    return (feat * att[:, :, None]).reshape(B, K, H, W)


if __name__ == "__main__":
    key = jax.random.PRNGKey(0)
    kk, ks, k1, k2, k3, k4 = jax.random.split(key, 6)

    B, C = 2, 4
    Hk, Wk = 8, 8            # template feature -> 64 correlation channels
    H, W = 16, 16            # search feature

    kernel_feat = jax.random.normal(kk, (B, C, Hk, Wk), dtype=jnp.float32)
    search_feat = jax.random.normal(ks, (B, C, H, W), dtype=jnp.float32)

    # CAModule(channels=64, reduction=1) parameters: two 1x1 convs, 64 -> 64.
    CH = Hk * Wk  # 64
    w1 = 0.1 * jax.random.normal(k1, (CH, CH, 1, 1), dtype=jnp.float32)
    b1 = 0.1 * jax.random.normal(k2, (CH,), dtype=jnp.float32)
    w2 = 0.1 * jax.random.normal(k3, (CH, CH, 1, 1), dtype=jnp.float32)
    b2 = 0.1 * jax.random.normal(k4, (CH,), dtype=jnp.float32)

    # 1) f32 path
    out = jax.block_until_ready(
        pixelwise_xcorr(kernel_feat, search_feat, w1, b1, w2, b2))
    ref = _reference(kernel_feat, search_feat, w1, b1, w2, b2)
    assert out.shape == (B, CH, H, W)
    assert jnp.allclose(out, ref, atol=1e-4, rtol=1e-4)

    # 2) non-128-multiple spatial size exercises the ragged last lane tile
    #    (masked boundary-block writes, no wrapper pad/slice passes)
    search_odd = jax.random.normal(ks, (B, C, 15, 15), dtype=jnp.float32)
    out_odd = jax.block_until_ready(
        pixelwise_xcorr(kernel_feat, search_odd, w1, b1, w2, b2))
    ref_odd = _reference(kernel_feat, search_odd, w1, b1, w2, b2)
    assert out_odd.shape == (B, CH, 15, 15)
    assert jnp.allclose(out_odd, ref_odd, atol=1e-4, rtol=1e-4)

    # 3) bf16 I/O path (f32 attention + f32 MXU accumulation inside);
    #    loose tolerance vs the f32 reference
    out_bf16 = jax.block_until_ready(
        pixelwise_xcorr(kernel_feat.astype(jnp.bfloat16),
                        search_feat.astype(jnp.bfloat16), w1, b1, w2, b2))
    assert out_bf16.dtype == jnp.bfloat16
    assert jnp.allclose(out_bf16.astype(jnp.float32), ref, atol=0.2, rtol=0.2)

    print("KERNEL_OK")
</pallas_src>

<mosaic_0001>
module attributes {stable_mosaic.version = 11 : i64} {
  func.func @_pxcorr_ca_kernel(%arg0: i32, %arg1: i32, %arg2: memref<2x4x64xf32, #tpu.memory_space<vmem>>, %arg3: memref<2x4x128xf32, #tpu.memory_space<vmem>>, %arg4: memref<2x4x1xf32, #tpu.memory_space<vmem>>, %arg5: memref<64x64xf32, #tpu.memory_space<vmem>>, %arg6: memref<1x64xf32, #tpu.memory_space<vmem>>, %arg7: memref<64x64xf32, #tpu.memory_space<vmem>>, %arg8: memref<1x64xf32, #tpu.memory_space<vmem>>, %arg9: memref<2x64x128xf32, #tpu.memory_space<vmem>>) attributes {dimension_semantics = [#tpu.dimension_semantics<parallel>, #tpu.dimension_semantics<parallel>], iteration_bounds = array<i64: 1, 2>, scalar_prefetch = 0 : i64, scratch_operands = 0 : i64, tpu.core_type = #tpu.core_type<tc>, window_params = [{transform_indices = @transform_0, window_bounds = array<i64: 2, 4, 64>}, {transform_indices = @transform_1, window_bounds = array<i64: 2, 4, 128>}, {transform_indices = @transform_2, window_bounds = array<i64: 2, 4, 1>}, {pipeline_mode = #tpu.pipeline_mode<synchronous>, transform_indices = @transform_3, window_bounds = array<i64: 64, 64>}, {pipeline_mode = #tpu.pipeline_mode<synchronous>, transform_indices = @transform_4, window_bounds = array<i64: 1, 64>}, {pipeline_mode = #tpu.pipeline_mode<synchronous>, transform_indices = @transform_5, window_bounds = array<i64: 64, 64>}, {pipeline_mode = #tpu.pipeline_mode<synchronous>, transform_indices = @transform_6, window_bounds = array<i64: 1, 64>}, {transform_indices = @transform_7, window_bounds = array<i64: 2, 64, 128>}]} {
    %c0 = arith.constant 0 : index
    %c0_0 = arith.constant 0 : index
    %c0_1 = arith.constant 0 : index
    %0 = vector.load %arg2[%c0, %c0_0, %c0_1] : memref<2x4x64xf32, #tpu.memory_space<vmem>>, vector<2x4x64xf32>
    %c0_2 = arith.constant 0 : index
    %c0_3 = arith.constant 0 : index
    %c0_4 = arith.constant 0 : index
    %1 = vector.load %arg4[%c0_2, %c0_3, %c0_4] : memref<2x4x1xf32, #tpu.memory_space<vmem>>, vector<2x4x1xf32>
    %2 = vector.broadcast %1 : vector<2x4x1xf32> to vector<2x4x64xf32>
    %3 = arith.mulf %0, %2 : vector<2x4x64xf32>
    %cst = arith.constant dense<0.000000e+00> : vector<2x64xf32>
    %4 = vector.multi_reduction <add>, %3, %cst [1] : vector<2x4x64xf32> to vector<2x64xf32>
    %c0_5 = arith.constant 0 : index
    %c0_6 = arith.constant 0 : index
    %5 = vector.load %arg5[%c0_5, %c0_6] : memref<64x64xf32, #tpu.memory_space<vmem>>, vector<64x64xf32>
    %cst_7 = arith.constant dense<0.000000e+00> : vector<2x64xf32>
    %6 = tpu.matmul %4, %5, %cst_7 {dimension_numbers = #tpu.dot_dimension_numbers<[1], [0], [0], [1], [0, 0, 1, 1], [], []>} : vector<2x64xf32>, vector<64x64xf32>, vector<2x64xf32> -> vector<2x64xf32>
    %c0_8 = arith.constant 0 : index
    %c0_9 = arith.constant 0 : index
    %7 = vector.load %arg6[%c0_8, %c0_9] : memref<1x64xf32, #tpu.memory_space<vmem>>, vector<1x64xf32>
    %8 = vector.broadcast %7 : vector<1x64xf32> to vector<2x64xf32>
    %9 = arith.addf %6, %8 : vector<2x64xf32>
    %cst_10 = arith.constant 0.000000e+00 : f32
    %10 = vector.broadcast %cst_10 : f32 to vector<2x64xf32>
    %11 = arith.maximumf %9, %10 : vector<2x64xf32>
    %c0_11 = arith.constant 0 : index
    %c0_12 = arith.constant 0 : index
    %12 = vector.load %arg7[%c0_11, %c0_12] : memref<64x64xf32, #tpu.memory_space<vmem>>, vector<64x64xf32>
    %cst_13 = arith.constant dense<0.000000e+00> : vector<2x64xf32>
    %13 = tpu.matmul %11, %12, %cst_13 {dimension_numbers = #tpu.dot_dimension_numbers<[1], [0], [0], [1], [0, 0, 1, 1], [], []>} : vector<2x64xf32>, vector<64x64xf32>, vector<2x64xf32> -> vector<2x64xf32>
    %c0_14 = arith.constant 0 : index
    %c0_15 = arith.constant 0 : index
    %14 = vector.load %arg8[%c0_14, %c0_15] : memref<1x64xf32, #tpu.memory_space<vmem>>, vector<1x64xf32>
    %15 = vector.broadcast %14 : vector<1x64xf32> to vector<2x64xf32>
    %16 = arith.addf %13, %15 : vector<2x64xf32>
    %17 = arith.negf %16 : vector<2x64xf32>
    %18 = math.exp %17 : vector<2x64xf32>
    %cst_16 = arith.constant 1.000000e+00 : f32
    %19 = vector.broadcast %cst_16 : f32 to vector<2x64xf32>
    %20 = arith.addf %19, %18 : vector<2x64xf32>
    %21 = arith.divf %19, %20 : vector<2x64xf32>
    %22 = vector.shape_cast %21 : vector<2x64xf32> to vector<2x1x64xf32>
    %23 = vector.broadcast %22 : vector<2x1x64xf32> to vector<2x4x64xf32>
    %24 = arith.mulf %0, %23 : vector<2x4x64xf32>
    %c0_17 = arith.constant 0 : index
    %c0_18 = arith.constant 0 : index
    %c0_19 = arith.constant 0 : index
    %25 = vector.load %arg3[%c0_17, %c0_18, %c0_19] : memref<2x4x128xf32, #tpu.memory_space<vmem>>, vector<2x4x128xf32>
    %cst_20 = arith.constant dense<0.000000e+00> : vector<2x64x128xf32>
    %26 = tpu.matmul %24, %25, %cst_20 {dimension_numbers = #tpu.dot_dimension_numbers<[1], [1], [2], [2], [0, 0, 0, 2, 1, 2], [0], [0]>} : vector<2x4x64xf32>, vector<2x4x128xf32>, vector<2x64x128xf32> -> vector<2x64x128xf32>
    %c0_21 = arith.constant 0 : index
    %c0_22 = arith.constant 0 : index
    %c0_23 = arith.constant 0 : index
    %27 = vector.load %arg9[%c0_21, %c0_22, %c0_23] : memref<2x64x128xf32, #tpu.memory_space<vmem>>, vector<2x64x128xf32>
    tpu.vector_store %arg9[%c0_21, %c0_22, %c0_23], %26 {strides = array<i32>} : memref<2x64x128xf32, #tpu.memory_space<vmem>>, vector<2x64x128xf32>,
    return
  }
  func.func @transform_0(%arg0: i32, %arg1: i32) -> (i32, i32, i32) {
    %c0_i32 = arith.constant 0 : i32
    %c0_i32_0 = arith.constant 0 : i32
    %c0_i32_1 = arith.constant 0 : i32
    return %arg0, %c0_i32, %c0_i32_0 : i32, i32, i32
  }
  func.func @transform_1(%arg0: i32, %arg1: i32) -> (i32, i32, i32) {
    %c0_i32 = arith.constant 0 : i32
    %c0_i32_0 = arith.constant 0 : i32
    return %arg0, %c0_i32, %arg1 : i32, i32, i32
  }
  func.func @transform_2(%arg0: i32, %arg1: i32) -> (i32, i32, i32) {
    %c0_i32 = arith.constant 0 : i32
    %c0_i32_0 = arith.constant 0 : i32
    %c0_i32_1 = arith.constant 0 : i32
    return %arg0, %c0_i32, %c0_i32_0 : i32, i32, i32
  }
  func.func @transform_3(%arg0: i32, %arg1: i32) -> (i32, i32) {
    %c0_i32 = arith.constant 0 : i32
    %c0_i32_0 = arith.constant 0 : i32
    %c0_i32_1 = arith.constant 0 : i32
    return %c0_i32, %c0_i32_0 : i32, i32
  }
  func.func @transform_4(%arg0: i32, %arg1: i32) -> (i32, i32) {
    %c0_i32 = arith.constant 0 : i32
    %c0_i32_0 = arith.constant 0 : i32
    %c0_i32_1 = arith.constant 0 : i32
    return %c0_i32, %c0_i32_0 : i32, i32
  }
  func.func @transform_5(%arg0: i32, %arg1: i32) -> (i32, i32) {
    %c0_i32 = arith.constant 0 : i32
    %c0_i32_0 = arith.constant 0 : i32
    %c0_i32_1 = arith.constant 0 : i32
    return %c0_i32, %c0_i32_0 : i32, i32
  }
  func.func @transform_6(%arg0: i32, %arg1: i32) -> (i32, i32) {
    %c0_i32 = arith.constant 0 : i32
    %c0_i32_0 = arith.constant 0 : i32
    %c0_i32_1 = arith.constant 0 : i32
    return %c0_i32, %c0_i32_0 : i32, i32
  }
  func.func @transform_7(%arg0: i32, %arg1: i32) -> (i32, i32, i32) {
    %c0_i32 = arith.constant 0 : i32
    %c0_i32_0 = arith.constant 0 : i32
    return %arg0, %c0_i32, %arg1 : i32, i32, i32
  }
}

</mosaic_0001>

<bundles_post_ra>
// kernel: pixelwise_xcorr.1
= control target key start
LH: loop header
LB: loop body
LE: loop exit
PB: predicated region body
PF: predicated region fallthrough
CT: control target
= control target key end

     0   :  { %s1486_s24 = smov 0   ;;  %s1488_s25 = smov 0   ;;  %s1682_s0 = inlined_call_operand.vmem [shape: f32[2,4,64], index: 0, kind: input, shape index: {}]   ;;  %s1683_s1 = inlined_call_operand.vmem [shape: f32[2,4,256], index: 1, kind: input, shape index: {}]   ;;  %s1684_s2 = inlined_call_operand.vmem [shape: f32[2,4,1], index: 2, kind: input, shape index: {}]   ;;  %s1685_s3 = inlined_call_operand.vmem [shape: f32[64,64], index: 3, kind: input, shape index: {}]   ;;  %s1686_s4 = inlined_call_operand.vmem [shape: f32[1,64], index: 4, kind: input, shape index: {}]   ;;  %s1687_s5 = inlined_call_operand.vmem [shape: f32[64,64], index: 5, kind: input, shape index: {}]   ;;  %s1688_s6 = inlined_call_operand.vmem [shape: f32[1,64], index: 6, kind: input, shape index: {}]   ;;  %s1689_s7 = inlined_call_operand.vmem [shape: f32[2,64,256], index: 7, kind: output, shape index: {}]  }
   0x1   :  { %s1490_s26 = smov 0   ;;  %s1492_s27 = smov 0  }
   0x2   :  { %s1494_s28 = smov 0  }
   0x3 LB: > { %s26_s29 = sadd.s32 1, %s1435_s27  ;;  %s1187_s30 = sadd.s32 4294967295, %s1439_s28   ;;  %s1439_s28 = sphi %s1494_s28, %s17_s28   ;;  %s1435_s27 = sphi %s1492_s27, %s1694_s27   ;;  %s1431_s26 = sphi %s1490_s26, %s1693_s26   ;;  %s1427_s25 = sphi %s1488_s25, %s1692_s25   ;;  %s1423_s24 = sphi %s1486_s24, %s1691_s24  }
   0x4   : > { %p27_p0 = scmp.ge.s32.totalorder %s26_s29, 2  ;;  %p71_p1 = scmp.ne.s32.totalorder %s1427_s25, %s1423_s24 }
   0x5   : > { %p72_p2 = scmp.eq.s32.totalorder %s1439_s28, 0  ;;  %p213_p4 = scmp.eq.s32.totalorder %s1187_s30, 1 }
   0x6   : > { %s1696_s29 = smov (%p27_p0, %s26_s29), 0  ;;  %s64_s9 = sadd.s32 1, %s1427_s25 }
   0x7   : > { %p73_p3 = por %p72_p2, %p71_p1  ;;  %s60_s8 = ssub.s32 %s1435_s27, %s1696_s29 }
   0x8   : > { %p62_p5 = scmp.eq.s32.totalorder %s60_s8, 0  ;;  %p1521_p6 = por %p213_p4, %p71_p1 }
   0x9   : > { %p1192_p7 = scmp.ge.s32.totalorder %s1439_s28, 2 }
   0xa   : > { %s1526_s11 = scalar_select %p62_p5, %s1427_s25, %s64_s9  }
   0xb   : > { %265 = sbr.rel (%p1192_p7) target bundleno = 25 (0x19), region = 40 }
  0x12   : > { %268 = sbr.rel (!%p73_p3) target bundleno = 25 (0x19), region = 44  ;;  %s270_s12 = sand.u32 (%p73_p3), 1, %s1427_s25  }
  0x13   : > { %s1194_s13 = sshll.u32 (%p73_p3), %s1435_s27, 2  ;;  %s1193_s14 = sshll.u32 (%p73_p3), %s270_s12, 3 }
  0x14   : > { %s277_s17 = scalar_lea.vmem (%p73_p3), %s1683_s1, %s1194_s13  ;;  %s272_s18 = scalar_lea.vmem (%p73_p3), [#allocation2], %s1193_s14 }
  0x15   : > { %v293_v0 = vld [vmem:[%s277_s17] sm:$0xf] (%p73_p3)  ;;  %v295_v1 = vld [vmem:[%s277_s17 + $0x8] sm:$0xf] (%p73_p3) }
  0x16   : > { %294 = vst [vmem:[%s272_s18] sm:$0xf] (%p73_p3), %v293_v0  ;;  %296 = vst [vmem:[%s272_s18 + $0x4] sm:$0xf] (%p73_p3), %v295_v1 }
  0x19 PF: > { %p1195_p8 = scmp.ge.s32.totalorder %s1439_s28, 1  ;;  %p322_p9 = scmp.lt.s32.totalorder %s1439_s28, 3 }
  0x1b   : > { %p323_p10 = pnand %p1195_p8, %p322_p9 }
  0x1c   : > { %v385_v2 = vld [vmem:[%s1684_s2] sm:$0xf] (!%p323_p10)  ;;  %v1441_v3 = vmov (!%p323_p10), 0   ;;  %v386_v4 = vld [vmem:[%s1684_s2 + $0x4] sm:$0xf] (!%p323_p10)  ;;  %v415_v6 = vld [vmem:[%s1685_s3 + $0x8] sm:$0xff] (!%p323_p10) }
  0x1d   : > { %326 = sbr.rel (%p323_p10) target bundleno = 1053 (0x41d), region = 85  ;;  %1396 = vset.pattern.permute.xlu0 (!%p323_p10), %v1441_v3  ;;  %v414_v5 = vld [vmem:[%s1685_s3] sm:$0xff] (!%p323_p10)  ;;  %v1442_v8 = vmov (!%p323_p10), 0.0|0.0   ;;  %v416_v9 = vld [vmem:[%s1685_s3 + $0x10] sm:$0xff] (!%p323_p10)  ;;  %v417_v10 = vld [vmem:[%s1685_s3 + $0x18] sm:$0xff] (!%p323_p10)  ;;  %vm1443_vm0 = vmmov (!%p323_p10), 0  }
  0x1e   : > { %389 = vperm.xlu0 (!%p323_p10), %1396, %v385_v2   ;;  %v1328_v7 = vpack.c.bf16 (!%p323_p10), %v415_v6, %v414_v5  ;;  %1327 = vmatprep.subr.bf16.mxu0 (!%p323_p10), %v1442_v8  ;;  %v1331_v11 = vpack.c.bf16 (!%p323_p10), %v417_v10, %v416_v9  ;;  %v418_v12 = vld [vmem:[%s1685_s3 + $0x20] sm:$0xff] (!%p323_p10)  ;;  %v419_v13 = vld [vmem:[%s1685_s3 + $0x28] sm:$0xff] (!%p323_p10)  ;;  %v420_v15 = vld [vmem:[%s1685_s3 + $0x30] sm:$0xff] (!%p323_p10)  ;;  %v1444_v18 = vmov (!%p323_p10), 0.0   ;;  %vm399_vm1 = vcmask (!%p323_p10), 519168   ;;  %s329_s18 = sand.u32 (!%p323_p10), 1, %s1423_s24  }
  0x1f   : > { %1339 = vmatprep.subr.bf16.mxu1 (!%p323_p10), %v1442_v8  ;;  %v1334_v14 = vpack.c.bf16 (!%p323_p10), %v419_v13, %v418_v12  ;;  %v421_v16 = vld [vmem:[%s1685_s3 + $0x38] sm:$0xff] (!%p323_p10)  ;;  %1277 = vmatprep.mubr.msk.f32.mxu0 (!%p323_p10), %vm1443_vm0, %v1444_v18  ;;  %v507_v19 = vld [vmem:[%s1687_s5] sm:$0xff] (!%p323_p10)  ;;  %v508_v20 = vld [vmem:[%s1687_s5 + $0x8] sm:$0xff] (!%p323_p10)  ;;  %vm431_vm2 = vcmask (!%p323_p10), 1041409   ;;  %vm433_vm3 = vcmask (!%p323_p10), 523264   ;;  %v605_v2 = vlaneseq (!%p323_p10)  ;;  %s1196_s19 = sshll.u32 (!%p323_p10), %s329_s18, 3 }
  0x20   : > { %1329 = vmatpush3.bf16.msra.mxu0 (!%p323_p10), %v1328_v7  ;;  %v1337_v17 = vpack.c.bf16 (!%p323_p10), %v421_v16, %v420_v15  ;;  %1296 = vmatprep.mubr.msk.f32.mxu1 (!%p323_p10), %vm1443_vm0, %v1444_v18  ;;  %v509_v21 = vld [vmem:[%s1687_s5 + $0x10] sm:$0xff] (!%p323_p10)  ;;  %v1340_v22 = vpack.c.bf16 (!%p323_p10), %v508_v20, %v507_v19  ;;  %v510_v23 = vld [vmem:[%s1687_s5 + $0x18] sm:$0xff] (!%p323_p10)  ;;  %v511_v25 = vld [vmem:[%s1687_s5 + $0x20] sm:$0xff] (!%p323_p10)  ;;  %v1445_v0 = vmov (!%p323_p10), 1966171168   ;;  %vm695_vm4 = vcmask (!%p323_p10), 1043456  }
  0x21   : > { %1330 = vmatprep.subr.bf16.mxu0 (!%p323_p10), %v1442_v8  ;;  %v1343_v24 = vpack.c.bf16 (!%p323_p10), %v510_v23, %v509_v21  ;;  %v512_v26 = vld [vmem:[%s1687_s5 + $0x28] sm:$0xff] (!%p323_p10)  ;;  %v383_v28 = vld [vmem:[%s1682_s0] sm:$0xf] (!%p323_p10)  ;;  %v1590_v31 = vld [vmem:[%s1682_s0 + $0x4] sm:$0xf] (!%p323_p10)  ;;  %v603_v1 = vunpack.c.l.s4 (!%p323_p10), %v1445_v0  ;;  %s331_s20 = scalar_lea.vmem (!%p323_p10), [#allocation2], %s1196_s19 }
  0x22   : > { %394 = vperm.xlu0 (!%p323_p10), %1396, %v386_v4   ;;  %1341 = vmatpush3.bf16.msra.mxu1 (!%p323_p10), %v1340_v22  ;;  %v1346_v27 = vpack.c.bf16 (!%p323_p10), %v512_v26, %v511_v25  ;;  %v513_v49 = vld [vmem:[%s1687_s5 + $0x30] sm:$0xff] (!%p323_p10)  ;;  %v514_v50 = vld [vmem:[%s1687_s5 + $0x38] sm:$0xff] (!%p323_p10)  ;;  %v1198_v52 = vld [vmem:[%s1686_s4] ss:$0 sm:$0xff] (!%p323_p10)  ;;  %v606_v4 = vshrl.u32 (!%p323_p10), %v605_v2, 7  ;;  %vm670_vm5 = vcmask (!%p323_p10), 31744  }
  0x23   : > { %1342 = vmatprep.subr.bf16.mxu1 (!%p323_p10), %v1442_v8  ;;  %v1349_v51 = vpack.c.bf16 (!%p323_p10), %v514_v50, %v513_v49  ;;  %v1200_v57 = vld [vmem:[%s1688_s6] ss:$0 sm:$0xff] (!%p323_p10)  ;;  %v604_v3 = vunpack.c.0.s8 (!%p323_p10), %v603_v1  ;;  %s1197_s21 = sshll.u32 (!%p323_p10), %s329_s18, 7 }
  0x24   : > { %1332 = vmatpush3.bf16.msra.mxu0 %v1331_v11  ;;  %v636_v12 = vld [vmem:[%s331_s20] sm:$0xf]  ;;  %s1627_s22 = scalar_lea.vmem [#allocation3], %s1197_s21  ;;  %s1222_s24 = sshll.u32 (%p1521_p6), %s1431_s26, 3 }
  0x25   : > { %1333 = vmatprep.subr.bf16.mxu0 %v1442_v8  ;;  %v607_v5 = vsub.s32 %v604_v3, %v606_v4  ;;  %s995_s8 = scalar_lea.vmem (%p1521_p6), %s1689_s7, %s1222_s24 }
  0x26   : > { %1344 = vmatpush3.bf16.msra.mxu1 %v1343_v24 }
  0x27   : > { %1345 = vmatprep.subr.bf16.mxu1 %v1442_v8 }
  0x28   : > { %1335 = vmatpush3.bf16.msra.mxu0 %v1334_v14 }
  0x29   : > { %1336 = vmatprep.subr.bf16.mxu0 %v1442_v8 }
  0x2a   : > { %1347 = vmatpush3.bf16.msra.mxu1 %v1346_v27 }
  0x2b   : > { %1348 = vmatprep.subr.bf16.mxu1 %v1442_v8  ;;  %v626_v8 = vsub.s32 0, %v606_v4 }
  0x2c   : > { %1338 = vmatpush3.bf16.msra.mxu0 %v1337_v17  ;;  %v637_v17 = vld [vmem:[%s331_s20 + $0x4] sm:$0xf] }
  0x2d   : > { %1299 = vmatprep.subr.msk.mxu0 %vm695_vm4, %v636_v12 }
  0x2e   : > { %1350 = vmatpush3.bf16.msra.mxu1 %v1349_v51 }
  0x2f   : > { %1313 = vmatprep.subr.msk.mxu1 %vm695_vm4, %v637_v17 }
  0x9d   : > { %v390_v29 = vpop.permute.xlu0 %389 }
  0x9e   : > { %v397_v30 = vmul.f32 %v390_v29, %v383_v28 }
  0xa0   : > { %v400_v32 = vsel %vm399_vm1, %v397_v30, 0.0 }
  0xa1   : > { %v401_v33 = vrot.slane %v400_v32, 4  ;;  %v395_v34 = vpop.permute.xlu0 %394 }
  0xa2   : > { %v398_v35 = vmul.f32 %v395_v34, %v1590_v31 }
  0xa3   : > { %v402_v36 = vadd.f32 %v401_v33, %v400_v32 }
  0xa4   : > { %v407_v37 = vsel %vm399_vm1, %v398_v35, 0.0 }
  0xa5   : > { %v403_v38 = vrot.slane %v402_v36, 2  ;;  %v408_v39 = vrot.slane %v407_v37, 4 }
  0xa7   : > { %v404_v40 = vadd.f32 %v403_v38, %v402_v36  ;;  %v409_v41 = vadd.f32 %v408_v39, %v407_v37 }
  0xa9   : > { %v410_v42 = vrot.slane %v409_v41, 2  ;;  %v405_v43 = vrot.slane %v404_v40, 1 }
  0xab   : > { %v411_v44 = vadd.f32 %v410_v42, %v409_v41  ;;  %v406_v46 = vadd.f32 %v405_v43, %v404_v40 }
  0xad   : > { %v412_v45 = vrot.slane %v411_v44, 1 }
  0xaf   : > { %v413_v47 = vadd.f32 %v412_v45, %v411_v44 }
  0xb1   : > { %v432_v48 = vsel %vm431_vm2, %v413_v47, %v406_v46 }
  0xb2   : > { %1278 = vmatmul.mubr.msk.f32.vlgmr.msra.gmra.mrb[0].mxu0 %vm433_vm3, %v432_v48 }
  0xb3   : > { %1300 = vmatpush3.msk.msra.mxu0 %vm695_vm4, %v636_v12 }
 0x185   : > { %v502_v53 = vpop.f32.mrb[0].mxu0 }
 0x186   : > { %v503_v54 = vadd.f32 %v1198_v52, %v502_v53  ;;  %v1279_v55 = vpop.f32.mrb[1].mxu0 }
 0x188   : > { %v506_v56 = vmax.f32 %v503_v54, 0.0 }
 0x18a   : > { %1297 = vmatmul.mubr.msk.f32.vlgmr.msra.gmra.mrb[0].mxu1 %vm433_vm3, %v506_v56 }
 0x18b   : > { %1314 = vmatpush3.msk.msra.mxu1 %vm695_vm4, %v637_v17 }
 0x25d   : > { %v591_v58 = vpop.f32.mrb[0].mxu1 }
 0x25e   : > { %v592_v59 = vadd.f32 %v1200_v57, %v591_v58  ;;  %v1298_v60 = vpop.f32.mrb[1].mxu1 }
 0x260   : > { %v1202_v61 = vmul.f32 -1.442695, %v592_v59 }
 0x262   : > { %1397 = vpow2.f32 %v1202_v61 }
 0x26c   : > { %v1398_v62 = vpop.eup %1397 }
 0x26d   : > { %v598_v63 = vadd.f32 1.0, %v1398_v62 }
 0x26f   : > { %1399 = vrcp.f32 %v598_v63 }
 0x279   : > { %v1400_v6 = vpop.eup %1399 }
 0x27a   : > { %v608_v7 = vrot.slane %v1400_v6, %v607_v5 }
 0x27c   : > { %v616_v9 = vrot.slane %v608_v7, %v607_v5  ;;  %v609_v13 = vcombine.high %v608_v7, %v608_v7 }
 0x27e   : > { %v627_v10 = vrot.slane %v616_v9, %v626_v8  ;;  %v623_v14 = vrot.slane %v609_v13, %v607_v5 }
 0x280   : > { %v634_v11 = vmul.f32 %v627_v10, %v383_v28  ;;  %v631_v15 = vrot.slane %v623_v14, %v626_v8 }
 0x282   : > { %638 = vxpose.xlu1.b32.start.end [1/1] (short) (narrow) %v634_v11, 64  ;;  %v635_v16 = vmul.f32 %v631_v15, %v1590_v31 }
 0x29f   : > { %804 = vxpose.xlu1.b32.start.end [1/1] (short) (narrow) %v635_v16, 64 }
 0x302   : > { %v654_v18 = vpop.trf.xlu1 }
 0x303   : > { %1301 = vmatprep.mubr.msk.f32.mxu0 %vm670_vm5, %v654_v18 }
 0x306   : > { %v655_v19 = vpop.trf.xlu1 }
 0x307   : > { %1302 = vmatmul.mubr.msk.f32.vlgmr.msra.gmra.mrb[2].mxu0 %vm670_vm5, %v655_v19 }
 0x30a   : > { %v656_v20 = vpop.trf.xlu1 }
 0x30b   : > { %1304 = vmatprep.mubr.msk.f32.mxu0 %vm670_vm5, %v656_v20 }
 0x30e   : > { %v657_v21 = vpop.trf.xlu1 }
 0x30f   : > { %1305 = vmatmul.mubr.msk.f32.gmra.mrb[4].mxu0 %vm670_vm5, %v657_v21 }
 0x312   : > { %v658_v22 = vpop.trf.xlu1 }
 0x313   : > { %1307 = vmatprep.mubr.msk.f32.mxu0 %vm670_vm5, %v658_v22 }
 0x316   : > { %v659_v23 = vpop.trf.xlu1 }
 0x317   : > { %1308 = vmatmul.mubr.msk.f32.gmra.mrb[6].mxu0 %vm670_vm5, %v659_v23 }
 0x31a   : > { %v660_v24 = vpop.trf.xlu1 }
 0x31b   : > { %1310 = vmatprep.mubr.msk.f32.mxu0 %vm670_vm5, %v660_v24 }
 0x31e   : > { %v661_v25 = vpop.trf.xlu1 }
 0x31f   : > { %1311 = vmatmul.mubr.msk.f32.gmra.mrb[8].mxu0 %vm670_vm5, %v661_v25 }
 0x322   : > { %v820_v26 = vpop.trf.xlu1 }
 0x323   : > { %1315 = vmatprep.mubr.msk.f32.mxu1 %vm670_vm5, %v820_v26 }
 0x326   : > { %v821_v27 = vpop.trf.xlu1 }
 0x327   : > { %1316 = vmatmul.mubr.msk.f32.vlgmr.msra.gmra.mrb[2].mxu1 %vm670_vm5, %v821_v27 }
 0x32a   : > { %v822_v28 = vpop.trf.xlu1 }
 0x32b   : > { %1318 = vmatprep.mubr.msk.f32.mxu1 %vm670_vm5, %v822_v28 }
 0x32e   : > { %v823_v29 = vpop.trf.xlu1 }
 0x32f   : > { %1319 = vmatmul.mubr.msk.f32.gmra.mrb[4].mxu1 %vm670_vm5, %v823_v29 }
 0x332   : > { %v824_v30 = vpop.trf.xlu1 }
 0x333   : > { %1321 = vmatprep.mubr.msk.f32.mxu1 %vm670_vm5, %v824_v30 }
 0x336   : > { %v825_v31 = vpop.trf.xlu1 }
 0x337   : > { %1322 = vmatmul.mubr.msk.f32.gmra.mrb[6].mxu1 %vm670_vm5, %v825_v31 }
 0x33a   : > { %v826_v32 = vpop.trf.xlu1 }
 0x33b   : > { %1324 = vmatprep.mubr.msk.f32.mxu1 %vm670_vm5, %v826_v32 }
 0x33e   : > { %v827_v33 = vpop.trf.xlu1 }
 0x33f   : > { %1325 = vmatmul.mubr.msk.f32.gmra.mrb[8].mxu1 %vm670_vm5, %v827_v33 }
 0x3da   : > { %v1303_v34 = vpop.f32.mrb[2].mxu0 }
 0x3db   : > { %969 = vst [vmem:[%s1627_s22 + $0x8] sm:$0xff] %v1303_v34  ;;  %v765_v35 = vpop.f32.mrb[3].mxu0 }
 0x3dc   : > { %968 = vst [vmem:[%s1627_s22] sm:$0xff] %v765_v35 }
 0x3e2   : > { %v1306_v36 = vpop.f32.mrb[4].mxu0  ;;  %v1055_v51 = vld [vmem:[%s1627_s22 + $0x8] sm:$0xff] (%p1521_p6) }
 0x3e3   : > { %971 = vst [vmem:[%s1627_s22 + $0x18] sm:$0xff] %v1306_v36  ;;  %v775_v37 = vpop.f32.mrb[5].mxu0  ;;  %v1053_v50 = vld [vmem:[%s1627_s22] sm:$0xff] (%p1521_p6)  ;;  %1056 = vst [vmem:[%s995_s8 + $0x10] sm:$0xff] (%p1521_p6), %v1055_v51 }
 0x3e4   : > { %970 = vst [vmem:[%s1627_s22 + $0x10] sm:$0xff] %v775_v37  ;;  %1054 = vst [vmem:[%s995_s8] sm:$0xff] (%p1521_p6), %v1053_v50 }
 0x3ea   : > { %v1309_v38 = vpop.f32.mrb[6].mxu0  ;;  %v1059_v53 = vld [vmem:[%s1627_s22 + $0x18] sm:$0xff] (%p1521_p6) }
 0x3eb   : > { %973 = vst [vmem:[%s1627_s22 + $0x28] sm:$0xff] %v1309_v38  ;;  %v785_v39 = vpop.f32.mrb[7].mxu0  ;;  %v1057_v52 = vld [vmem:[%s1627_s22 + $0x10] sm:$0xff] (%p1521_p6)  ;;  %1060 = vst [vmem:[%s995_s8 + $0x30] sm:$0xff] (%p1521_p6), %v1059_v53 }
 0x3ec   : > { %972 = vst [vmem:[%s1627_s22 + $0x20] sm:$0xff] %v785_v39  ;;  %1058 = vst [vmem:[%s995_s8 + $0x20] sm:$0xff] (%p1521_p6), %v1057_v52 }
 0x3f2   : > { %v1312_v40 = vpop.f32.mrb[8].mxu0  ;;  %v1063_v55 = vld [vmem:[%s1627_s22 + $0x28] sm:$0xff] (%p1521_p6) }
 0x3f3   : > { %975 = vst [vmem:[%s1627_s22 + $0x38] sm:$0xff] %v1312_v40  ;;  %v795_v41 = vpop.f32.mrb[9].mxu0  ;;  %v1061_v54 = vld [vmem:[%s1627_s22 + $0x20] sm:$0xff] (%p1521_p6)  ;;  %1064 = vst [vmem:[%s995_s8 + $0x50] sm:$0xff] (%p1521_p6), %v1063_v55 }
 0x3f4   : > { %974 = vst [vmem:[%s1627_s22 + $0x30] sm:$0xff] %v795_v41  ;;  %1062 = vst [vmem:[%s995_s8 + $0x40] sm:$0xff] (%p1521_p6), %v1061_v54 }
 0x3fa   : > { %v1317_v42 = vpop.f32.mrb[2].mxu1  ;;  %v1067_v57 = vld [vmem:[%s1627_s22 + $0x38] sm:$0xff] (%p1521_p6) }
 0x3fb   : > { %977 = vst [vmem:[%s1627_s22 + $0x48] sm:$0xff] %v1317_v42  ;;  %v929_v43 = vpop.f32.mrb[3].mxu1  ;;  %v1065_v56 = vld [vmem:[%s1627_s22 + $0x30] sm:$0xff] (%p1521_p6)  ;;  %1068 = vst [vmem:[%s995_s8 + $0x70] sm:$0xff] (%p1521_p6), %v1067_v57 }
 0x3fc   : > { %976 = vst [vmem:[%s1627_s22 + $0x40] sm:$0xff] %v929_v43  ;;  %1066 = vst [vmem:[%s995_s8 + $0x60] sm:$0xff] (%p1521_p6), %v1065_v56 }
 0x402   : > { %v1320_v44 = vpop.f32.mrb[4].mxu1  ;;  %v1071_v59 = vld [vmem:[%s1627_s22 + $0x48] sm:$0xff] (%p1521_p6) }
 0x403   : > { %979 = vst [vmem:[%s1627_s22 + $0x58] sm:$0xff] %v1320_v44  ;;  %v939_v45 = vpop.f32.mrb[5].mxu1  ;;  %v1069_v58 = vld [vmem:[%s1627_s22 + $0x40] sm:$0xff] (%p1521_p6)  ;;  %1072 = vst [vmem:[%s995_s8 + $0x90] sm:$0xff] (%p1521_p6), %v1071_v59 }
 0x404   : > { %978 = vst [vmem:[%s1627_s22 + $0x50] sm:$0xff] %v939_v45  ;;  %1070 = vst [vmem:[%s995_s8 + $0x80] sm:$0xff] (%p1521_p6), %v1069_v58 }
 0x40a   : > { %v1323_v46 = vpop.f32.mrb[6].mxu1  ;;  %v1075_v61 = vld [vmem:[%s1627_s22 + $0x58] sm:$0xff] (%p1521_p6) }
 0x40b   : > { %981 = vst [vmem:[%s1627_s22 + $0x68] sm:$0xff] %v1323_v46  ;;  %v949_v47 = vpop.f32.mrb[7].mxu1  ;;  %v1073_v60 = vld [vmem:[%s1627_s22 + $0x50] sm:$0xff] (%p1521_p6)  ;;  %1076 = vst [vmem:[%s995_s8 + $0xb0] sm:$0xff] (%p1521_p6), %v1075_v61 }
 0x40c   : > { %980 = vst [vmem:[%s1627_s22 + $0x60] sm:$0xff] %v949_v47  ;;  %1074 = vst [vmem:[%s995_s8 + $0xa0] sm:$0xff] (%p1521_p6), %v1073_v60 }
 0x40e   : > { %990 = sbr.rel (!%p1521_p6) target bundleno = 1053 (0x41d), region = 93 }
 0x412   : > { %v1326_v48 = vpop.f32.mrb[8].mxu1  ;;  %v1079_v63 = vld [vmem:[%s1627_s22 + $0x68] sm:$0xff] (%p1521_p6) }
 0x413   : > { %983 = vst [vmem:[%s1627_s22 + $0x78] sm:$0xff] %v1326_v48  ;;  %v959_v49 = vpop.f32.mrb[9].mxu1  ;;  %v1077_v62 = vld [vmem:[%s1627_s22 + $0x60] sm:$0xff] (%p1521_p6)  ;;  %1080 = vst [vmem:[%s995_s8 + $0xd0] sm:$0xff] (%p1521_p6), %v1079_v63 }
 0x414   : > { %982 = vst [vmem:[%s1627_s22 + $0x70] sm:$0xff] %v959_v49  ;;  %1078 = vst [vmem:[%s995_s8 + $0xc0] sm:$0xff] (%p1521_p6), %v1077_v62 }
 0x41a   : > { %v1083_v1 = vld [vmem:[%s1627_s22 + $0x78] sm:$0xff] }
 0x41b   : > { %v1081_v0 = vld [vmem:[%s1627_s22 + $0x70] sm:$0xff]  ;;  %1084 = vst [vmem:[%s995_s8 + $0xf0] sm:$0xff] %v1083_v1 }
 0x41c   : > { %1082 = vst [vmem:[%s995_s8 + $0xe0] sm:$0xff] %v1081_v0 }
 0x41d PF: > { %s17_s28 = sadd.s32 1, %s1439_s28   ;;  %s1691_s24 = smov %s1427_s25 }
 0x41e   : > { %p14_p11 = scmp.ge.s32.totalorder %s17_s28, 4   ;;  %s1692_s25 = smov %s1526_s11 }
 0x41f   : > { %s1693_s26 = smov %s1435_s27  ;;  %s1694_s27 = smov %s1696_s29 }
 0x420   :  { %16 = sbr.rel (!%p14_p11) target bundleno = 3 (0x3), region = 168 }

</bundles_post_ra>
